<compile_context>
chip_gen: v5e
topology: v5e:2x2
jax: 0.10.0
libtpu: 0.0.40
codegen_flags: <defaults>
</compile_context>

<pallas_src>
import jax
import jax.numpy as jnp
from jax.experimental import pallas as pl
from jax.experimental.pallas import tpu as pltpu

EPS = 1e-5      # nn.BatchNorm2d default eps
LANE = 128      # pad output-channel axes to this for lane-dense stores
TM_MAX = 1024   # max rows (N*Ho*Wo) per grid step


# ----------------------------------------------------------------------------
# Kernels (BN scale already folded into the weight columns)
# ----------------------------------------------------------------------------
def _conv_shift_relu_kernel(x_ref, w_ref, shift_ref, out_ref):
    # conv1: y = relu(x @ w + shift), emitted in out_ref.dtype (bf16).
    y = jnp.dot(x_ref[...], w_ref[...], preferred_element_type=jnp.float32)
    out_ref[...] = jnp.maximum(y + shift_ref[...], 0.0).astype(out_ref.dtype)


def _conv_shift_add_relu_kernel(x_ref, w_ref, shift_ref, res_ref, out_ref):
    # conv2 (stride==1): y = relu(x @ w + shift + residual)
    y = jnp.dot(x_ref[...], w_ref[...], preferred_element_type=jnp.float32)
    y = y + shift_ref[...] + res_ref[...].astype(jnp.float32)
    out_ref[...] = jnp.maximum(y, 0.0).astype(out_ref.dtype)


def _conv_ds_add_relu_kernel(x_ref, w_ref, shift_ref,
                             xs_ref, wds_ref, shiftds_ref, out_ref):
    # conv2 (stride!=1): the 1x1 downsample conv + its BN are fused in-kernel.
    y = jnp.dot(x_ref[...], w_ref[...], preferred_element_type=jnp.float32)
    r = jnp.dot(xs_ref[...], wds_ref[...], preferred_element_type=jnp.float32)
    y = y + shift_ref[...] + r + shiftds_ref[...]
    out_ref[...] = jnp.maximum(y, 0.0).astype(out_ref.dtype)


# ----------------------------------------------------------------------------
# Pallas wrapper
# ----------------------------------------------------------------------------
def _round_up(x, m):
    return (x + m - 1) // m * m


def _pick_tm(m):
    """Largest row tile (multiple of 8, <= TM_MAX) that still yields >= 2
    'parallel' grid steps, so both v7x TensorCores get work."""
    mp8 = _round_up(m, 8)
    if mp8 <= 8:
        return mp8
    return min(TM_MAX, _round_up((mp8 + 1) // 2, 8))


def _pad_k(k):
    # multiple of 128 (x lane axis / w sublane axis) at real channel counts;
    # multiple of 16 (bf16 sublane pack) for toy sizes.
    return _round_up(k, 128) if k >= 128 else _round_up(k, 16)


def _pad2d(a, rows, cols):
    pr, pc = rows - a.shape[0], cols - a.shape[1]
    if pr == 0 and pc == 0:
        return a
    return jnp.pad(a, ((0, pr), (0, pc)))


def fused_conv(x2d, w2d, shift, *, out_dtype=jnp.float32,
               residual=None, ds=None):
    """y = relu(x2d @ w2d + shift [+ residual | + xs @ w_ds + shift_ds]).

    x2d: (M, K) activations (any float dtype; DMA'd as bf16).
    w2d: (K, C) weights with BN scale pre-folded into columns.
    residual: optional (M, C) identity residual (DMA'd as bf16).
    ds: optional (xs (M, Kd), w_ds (Kd, C), shift_ds (C,)) fused 1x1 conv.
    """
    m, k = x2d.shape
    c = w2d.shape[1]
    cp = _round_up(max(c, LANE), LANE)
    kp = _pad_k(k)
    tm = _pick_tm(m)
    mp = _round_up(m, tm)

    xb = _pad2d(x2d.astype(jnp.bfloat16), mp, kp)
    wb = _pad2d(w2d.astype(jnp.bfloat16), kp, cp)
    sh = _pad2d(shift.astype(jnp.float32)[None, :], 1, cp)

    in_specs = [
        pl.BlockSpec((tm, kp), lambda i: (i, 0)),
        pl.BlockSpec((kp, cp), lambda i: (0, 0)),
        pl.BlockSpec((1, cp), lambda i: (0, 0)),
    ]
    args = [xb, wb, sh]

    # per-step input bytes (bf16 activations/weights, f32 shift rows)
    bytes_in = tm * kp * 2 + kp * cp * 2 + cp * 4

    if ds is not None:
        xs2d, wds2d, shift_ds = ds
        kdp = _pad_k(xs2d.shape[1])
        args += [
            _pad2d(xs2d.astype(jnp.bfloat16), mp, kdp),
            _pad2d(wds2d.astype(jnp.bfloat16), kdp, cp),
            _pad2d(shift_ds.astype(jnp.float32)[None, :], 1, cp),
        ]
        in_specs += [
            pl.BlockSpec((tm, kdp), lambda i: (i, 0)),
            pl.BlockSpec((kdp, cp), lambda i: (0, 0)),
            pl.BlockSpec((1, cp), lambda i: (0, 0)),
        ]
        bytes_in += tm * kdp * 2 + kdp * cp * 2 + cp * 4
        kernel = _conv_ds_add_relu_kernel
    elif residual is not None:
        args.append(_pad2d(residual.astype(jnp.bfloat16), mp, cp))
        in_specs.append(pl.BlockSpec((tm, cp), lambda i: (i, 0)))
        bytes_in += tm * cp * 2
        kernel = _conv_shift_add_relu_kernel
    else:
        kernel = _conv_shift_relu_kernel

    bytes_out = tm * cp * jnp.dtype(out_dtype).itemsize
    vmem_budget = 2 * (bytes_in + bytes_out)          # double-buffered
    vmem_limit = int(min(64 << 20, max(32 << 20, 2 * vmem_budget)))

    out = pl.pallas_call(
        kernel,
        out_shape=jax.ShapeDtypeStruct((mp, cp), out_dtype),
        grid=(mp // tm,),
        in_specs=in_specs,
        out_specs=pl.BlockSpec((tm, cp), lambda i: (i, 0)),
        compiler_params=pltpu.CompilerParams(
            dimension_semantics=("parallel",),
            vmem_limit_bytes=vmem_limit),
    )(*args)
    return out[:m, :c]


# ----------------------------------------------------------------------------
# im2col glue (plain JAX, on bf16 data): 3x3, padding=1, arbitrary stride
# ----------------------------------------------------------------------------
def _im2col_3x3(x_nhwc, stride):
    n, h, w, c = x_nhwc.shape
    ho = (h - 1) // stride + 1
    wo = (w - 1) // stride + 1
    xp = jnp.pad(x_nhwc, ((0, 0), (1, 1), (1, 1), (0, 0)))
    taps = []
    for dy in range(3):
        for dx in range(3):
            taps.append(xp[:, dy:dy + (ho - 1) * stride + 1:stride,
                           dx:dx + (wo - 1) * stride + 1:stride, :])
    cols = jnp.concatenate(taps, axis=-1)            # (n, ho, wo, 9*c)
    return cols.reshape(n * ho * wo, 9 * c), (ho, wo)


# ----------------------------------------------------------------------------
# Parameter init (deterministic, synthetic) and forward
# ----------------------------------------------------------------------------
def init_params(key, in_channels, stride):
    cout = stride * in_channels
    ks = jax.random.split(key, 18)

    def nrm(k, shape, s=0.1):
        return s * jax.random.normal(k, shape, jnp.float32)

    p = {
        "w1": nrm(ks[0], (3, 3, in_channels, cout)),   # HWIO
        "b1": nrm(ks[1], (cout,)),
        "g1": 1.0 + nrm(ks[2], (cout,)),
        "be1": nrm(ks[3], (cout,)),
        "m1": nrm(ks[4], (cout,)),
        "v1": 1.0 + jnp.abs(nrm(ks[5], (cout,))),
        "w2": nrm(ks[6], (3, 3, cout, cout)),
        "b2": nrm(ks[7], (cout,)),
        "g2": 1.0 + nrm(ks[8], (cout,)),
        "be2": nrm(ks[9], (cout,)),
        "m2": nrm(ks[10], (cout,)),
        "v2": 1.0 + jnp.abs(nrm(ks[11], (cout,))),
    }
    if stride != 1:
        p.update({
            "w_ds": nrm(ks[12], (1, 1, in_channels, cout)),
            "b_ds": nrm(ks[13], (cout,)),
            "g_ds": 1.0 + nrm(ks[14], (cout,)),
            "be_ds": nrm(ks[15], (cout,)),
            "m_ds": nrm(ks[16], (cout,)),
            "v_ds": 1.0 + jnp.abs(nrm(ks[17], (cout,))),
        })
    return p


def _fold_bn(w2d, bias, gamma, beta, mean, var):
    """Fold eval-mode BN into the conv: scale into weight columns, bias+BN
    shift into a per-channel shift applied in the kernel epilogue."""
    scale = gamma / jnp.sqrt(var + EPS)
    w_folded = w2d * scale[None, :]
    shift = beta + (bias - mean) * scale
    return w_folded, shift


def residual_block_forward(params, x_nchw, stride=1):
    n, cin, h, w = x_nchw.shape
    cout = stride * cin
    # NHWC, cast to bf16 once up front (MXU-native; pad/im2col stay bf16).
    x = jnp.transpose(x_nchw, (0, 2, 3, 1)).astype(jnp.bfloat16)

    w1, sh1 = _fold_bn(params["w1"].reshape(9 * cin, cout), params["b1"],
                       params["g1"], params["be1"], params["m1"], params["v1"])
    w2, sh2 = _fold_bn(params["w2"].reshape(9 * cout, cout), params["b2"],
                       params["g2"], params["be2"], params["m2"], params["v2"])

    # conv_1: 3x3 stride-s conv + BN + ReLU  (one fused matmul kernel),
    # intermediate kept in bf16 (it feeds the next bf16 matmul anyway).
    cols1, (ho, wo) = _im2col_3x3(x, stride)
    y1 = fused_conv(cols1, w1, sh1, out_dtype=jnp.bfloat16)
    y1 = y1.reshape(n, ho, wo, cout)

    # conv_2: 3x3 stride-1 conv + BN + residual add + final ReLU, one kernel.
    cols2, _ = _im2col_3x3(y1, 1)
    if stride != 1:
        # Fuse the 1x1 strided downsample conv + its BN into the same kernel.
        wds, shds = _fold_bn(params["w_ds"].reshape(cin, cout), params["b_ds"],
                             params["g_ds"], params["be_ds"],
                             params["m_ds"], params["v_ds"])
        xs = x[:, ::stride, ::stride, :].reshape(n * ho * wo, cin)
        out = fused_conv(cols2, w2, sh2, ds=(xs, wds, shds))
    else:
        res = x.reshape(n * h * w, cin)
        out = fused_conv(cols2, w2, sh2, residual=res)

    out = out.reshape(n, ho, wo, cout)
    return jnp.transpose(out, (0, 3, 1, 2))                        # NCHW


# ----------------------------------------------------------------------------
# Pure-JAX reference (for correctness check)
# ----------------------------------------------------------------------------
def reference_forward(params, x_nchw, stride=1):
    x = jnp.transpose(x_nchw, (0, 2, 3, 1)).astype(jnp.float32)
    dn = ("NHWC", "HWIO", "NHWC")

    def bn(y, g, be, m, v):
        return (y - m) / jnp.sqrt(v + EPS) * g + be

    y = jax.lax.conv_general_dilated(x, params["w1"], (stride, stride),
                                     ((1, 1), (1, 1)),
                                     dimension_numbers=dn) + params["b1"]
    y = jnp.maximum(bn(y, params["g1"], params["be1"], params["m1"], params["v1"]), 0.0)
    y = jax.lax.conv_general_dilated(y, params["w2"], (1, 1),
                                     ((1, 1), (1, 1)),
                                     dimension_numbers=dn) + params["b2"]
    y = bn(y, params["g2"], params["be2"], params["m2"], params["v2"])

    if stride != 1:
        r = jax.lax.conv_general_dilated(x, params["w_ds"], (stride, stride),
                                         "VALID", dimension_numbers=dn) + params["b_ds"]
        r = bn(r, params["g_ds"], params["be_ds"], params["m_ds"], params["v_ds"])
    else:
        r = x

    out = jnp.maximum(r + y, 0.0)
    return jnp.transpose(out, (0, 3, 1, 2))


if __name__ == "__main__":
    key = jax.random.PRNGKey(0)
    N, CIN, H, W = 2, 4, 16, 16

    for stride in (1, 2):
        kx, kp = jax.random.split(jax.random.fold_in(key, stride))
        x = jax.random.normal(kx, (N, CIN, H, W), jnp.float32)   # NCHW like PyTorch
        params = init_params(kp, CIN, stride)

        out = residual_block_forward(params, x, stride)
        out = jax.block_until_ready(out)

        cout = stride * CIN
        ho = (H - 1) // stride + 1
        assert out.shape == (N, cout, ho, ho), out.shape

        ref = reference_forward(params, x, stride)
        assert jnp.allclose(out, ref, atol=3e-2, rtol=3e-2), (
            "max abs diff:", float(jnp.max(jnp.abs(out - ref))))

    print("KERNEL_OK")
</pallas_src>

<mosaic_0001>
module attributes {stable_mosaic.version = 11 : i64} {
  func.func @_conv_shift_relu_kernel(%arg0: i32, %arg1: memref<256x48xbf16, #tpu.memory_space<vmem>>, %arg2: memref<48x128xbf16, #tpu.memory_space<vmem>>, %arg3: memref<1x128xf32, #tpu.memory_space<vmem>>, %arg4: memref<256x128xbf16, #tpu.memory_space<vmem>>) attributes {dimension_semantics = [#tpu.dimension_semantics<parallel>], iteration_bounds = array<i64: 2>, scalar_prefetch = 0 : i64, scratch_operands = 0 : i64, tpu.core_type = #tpu.core_type<tc>, window_params = [{transform_indices = @transform_0, window_bounds = array<i64: 256, 48>}, {pipeline_mode = #tpu.pipeline_mode<synchronous>, transform_indices = @transform_1, window_bounds = array<i64: 48, 128>}, {pipeline_mode = #tpu.pipeline_mode<synchronous>, transform_indices = @transform_2, window_bounds = array<i64: 1, 128>}, {transform_indices = @transform_3, window_bounds = array<i64: 256, 128>}]} {
    %c0 = arith.constant 0 : index
    %c0_0 = arith.constant 0 : index
    %0 = vector.load %arg1[%c0, %c0_0] : memref<256x48xbf16, #tpu.memory_space<vmem>>, vector<256x48xbf16>
    %c0_1 = arith.constant 0 : index
    %c0_2 = arith.constant 0 : index
    %1 = vector.load %arg2[%c0_1, %c0_2] : memref<48x128xbf16, #tpu.memory_space<vmem>>, vector<48x128xbf16>
    %cst = arith.constant dense<0.000000e+00> : vector<256x128xf32>
    %2 = tpu.matmul %0, %1, %cst {dimension_numbers = #tpu.dot_dimension_numbers<[1], [0], [0], [1], [0, 0, 1, 1], [], []>} : vector<256x48xbf16>, vector<48x128xbf16>, vector<256x128xf32> -> vector<256x128xf32>
    %c0_3 = arith.constant 0 : index
    %c0_4 = arith.constant 0 : index
    %3 = vector.load %arg3[%c0_3, %c0_4] : memref<1x128xf32, #tpu.memory_space<vmem>>, vector<1x128xf32>
    %4 = vector.broadcast %3 : vector<1x128xf32> to vector<256x128xf32>
    %5 = arith.addf %2, %4 : vector<256x128xf32>
    %cst_5 = arith.constant 0.000000e+00 : f32
    %6 = vector.broadcast %cst_5 : f32 to vector<256x128xf32>
    %7 = arith.maximumf %5, %6 : vector<256x128xf32>
    %8 = arith.truncf %7 : vector<256x128xf32> to vector<256x128xbf16>
    %c0_6 = arith.constant 0 : index
    %c0_7 = arith.constant 0 : index
    %9 = vector.load %arg4[%c0_6, %c0_7] : memref<256x128xbf16, #tpu.memory_space<vmem>>, vector<256x128xbf16>
    tpu.vector_store %arg4[%c0_6, %c0_7], %8 {strides = array<i32>} : memref<256x128xbf16, #tpu.memory_space<vmem>>, vector<256x128xbf16>,
    return
  }
  func.func @transform_0(%arg0: i32) -> (i32, i32) {
    %c0_i32 = arith.constant 0 : i32
    %c0_i32_0 = arith.constant 0 : i32
    return %arg0, %c0_i32 : i32, i32
  }
  func.func @transform_1(%arg0: i32) -> (i32, i32) {
    %c0_i32 = arith.constant 0 : i32
    %c0_i32_0 = arith.constant 0 : i32
    %c0_i32_1 = arith.constant 0 : i32
    return %c0_i32, %c0_i32_0 : i32, i32
  }
  func.func @transform_2(%arg0: i32) -> (i32, i32) {
    %c0_i32 = arith.constant 0 : i32
    %c0_i32_0 = arith.constant 0 : i32
    %c0_i32_1 = arith.constant 0 : i32
    return %c0_i32, %c0_i32_0 : i32, i32
  }
  func.func @transform_3(%arg0: i32) -> (i32, i32) {
    %c0_i32 = arith.constant 0 : i32
    %c0_i32_0 = arith.constant 0 : i32
    return %arg0, %c0_i32 : i32, i32
  }
}

</mosaic_0001>

<bundles_post_ra>
// kernel: tpu_custom_call.1
= control target key start
LH: loop header
LB: loop body
LE: loop exit
PB: predicated region body
PF: predicated region fallthrough
CT: control target
= control target key end

     0   :  { %8 = vsyncpa [#allocation3], 0  ;;  %s1168_s0 = inlined_call_operand.vmem [shape: bf16[512,48], index: 0, kind: input, shape index: {}]   ;;  %s1169_s1 = inlined_call_operand.vmem [shape: bf16[48,128], index: 1, kind: input, shape index: {}]   ;;  %s1170_s2 = inlined_call_operand.vmem [shape: f32[1,128], index: 2, kind: input, shape index: {}]   ;;  %s1171_s3 = inlined_call_operand.hbm [shape: bf16[512,128], index: 3, kind: output, shape index: {}]  }
   0x1   :  { %10 = vsyncpa [#allocation3 + $0x1], 0  ;;  %s981_s12 = smov 0   ;;  %s983_s13 = smov 0  }
   0x2   :  { %s985_s14 = smov 0   ;;  %s987_s15 = smov 0  }
   0x3 LB: > { %s1002_s16 = sadd.s32 4294967295, %s957_s15   ;;  %s625_s17 = sadd.s32 4294967294, %s957_s15   ;;  %s957_s15 = sphi %s987_s15, %s1177_s15   ;;  %s953_s14 = sphi %s985_s14, %s1176_s14   ;;  %s949_s13 = sphi %s983_s13, %s1175_s13   ;;  %s945_s12 = sphi %s981_s12, %s1174_s12  }
   0x4   : > { %s1006_s18 = sadd.s32 1, %s957_s15   ;;  %s91_s19 = sadd.s32 1, %s953_s14 }
   0x5   : > { %s88_s20 = ssub.s32 %s957_s15, %s1006_s18  ;;  %p101_p0 = scmp.ne.s32.totalorder %s953_s14, %s949_s13 }
   0x6   : > { %p89_p1 = scmp.eq.s32.totalorder %s88_s20, 0  ;;  %p102_p2 = scmp.eq.s32.totalorder %s1002_s16, 1 }
   0x7   : > { %p107_p3 = scmp.ne.s32.totalorder %s949_s13, %s945_s12  ;;  %p108_p4 = scmp.eq.s32.totalorder %s625_s17, 1 }
   0x8   : > { %s1017_s21 = scalar_select %p89_p1, %s953_s14, %s91_s19  }
   0x9   : > { %p1019_p5 = por %p102_p2, %p101_p0  ;;  %p1023_p6 = por %p108_p4, %p107_p3 }
   0xa   : > { %p628_p7 = scmp.ge.s32.totalorder %s957_s15, 1  ;;  %p141_p8 = scmp.lt.s32.totalorder %s957_s15, 3 }
   0xc   : > { %p142_p9 = pnand %p628_p7, %p141_p8 }
   0xd   : > { %s630_s26 = sshll.u32 (!%p142_p9), %s1002_s16, 5  ;;  %s162_s10 = sand.u32 (!%p142_p9), 1, %s949_s13  }
   0xe   : > { %145 = sbr.rel (%p142_p9) target bundleno = 231 (0xe7), region = 32  ;;  %p166_p10 = scmp.lt.s32.totalorder (!%p142_p9), %s630_s26, 63 }
   0xf   : > { %s629_s11 = sshll.u32 (!%p142_p9), %s162_s10, 7  ;;  %s748_s19 = sshll.u32 (!%p142_p9), %s1002_s16, 7 }
  0x10   : > { %s1090_s17 = scalar_lea.vmem (!%p142_p9), [#allocation2], %s629_s11  ;;  %s559_s25 = scalar_lea.hbm (!%p142_p9), %s1171_s3, %s748_s19 }
  0x11   : > { %s560_s16 = sshll.u32 (!%p142_p9), %s1090_s17, 4  ;;  %s548_s27 = scalar_lea.sflag (!%p142_p9), [#allocation3], %s162_s10  ;;  %s561_s16 = int_to_ptr.vmem [resolvable:$true] %s560_s16 }
  0x12   : > { %s915_s5 = scalar_lea.hbm (!%p142_p9), %s1171_s3, 256 }
  0x13   : > { %v747_v0 = vld [vmem:[%s1169_s1 + $0x10] sm:$0xff]  ;;  %v746_v1 = vld [vmem:[%s1169_s1 + $0x8] sm:$0xff]  ;;  %s1179_s26 = smov (!%p166_p10, %s630_s26), 63  ;;  %v745_v2 = vld [vmem:[%s1169_s1] sm:$0xff]  ;;  %vm313_vm0 = vcmask 392192  }
  0x14   : > { %367 = vmatpush.bf16.msra.mxu0 %v747_v0  ;;  %844 = vmatpush.bf16.msra.mxu1 %v747_v0  ;;  %s631_s29 = sshll.u32 %s1179_s26, 2  ;;  %v1079_v21 = vld [vmem:[%s1170_s2] ss:$0 sm:$0xff]  ;;  %s562_s26 = sshll.u32 %s559_s25, 4  ;;  %s563_s26 = int_to_ptr.hbm [resolvable:$true] %s562_s26 }
  0x15   : > { %845 = vmatpush.bf16.msra.mxu2 %v747_v0  ;;  %846 = vmatpush.bf16.msra.mxu3 %v747_v0  ;;  %s1042_s7 = scalar_lea.vmem %s1168_s0, %s631_s29  ;;  %s909_s28 = sshra.s32 %s563_s26, 4  ;;  %s910_s28 = int_to_ptr.hbm [resolvable:$true] %s909_s28 }
  0x16   : > { %v729_v3 = vld [vmem:[%s1042_s7] sm:$0xff]  ;;  %v730_v7 = vld [vmem:[%s1042_s7 + $0x8] sm:$0xff]  ;;  %v731_v11 = vld [vmem:[%s1042_s7 + $0x10] sm:$0xff]  ;;  %s911_s29 = scalar_lea.hbm %s910_s28, 128  ;;  %p916_p0 = scmp.lt.s32.totalorder %s910_s28, %s1171_s3 }
  0x17   : > { %v733_v4 = vld [vmem:[%s1042_s7 + $0x20] sm:$0xff]  ;;  %v734_v8 = vld [vmem:[%s1042_s7 + $0x28] sm:$0xff]  ;;  %v735_v12 = vld [vmem:[%s1042_s7 + $0x30] sm:$0xff]  ;;  %p912_p11 = scmp.ne.s32.totalorder %s910_s28, %s911_s29  ;;  %p917_p1 = scmp.lt.s32.totalorder %s915_s5, %s911_s29 }
  0x18   : > { %368 = vmatpush.bf16.msra.mxu0 %v746_v1  ;;  %847 = vmatpush.bf16.msra.mxu1 %v746_v1  ;;  %v737_v5 = vld [vmem:[%s1042_s7 + $0x40] sm:$0xff]  ;;  %v738_v9 = vld [vmem:[%s1042_s7 + $0x48] sm:$0xff]  ;;  %v739_v13 = vld [vmem:[%s1042_s7 + $0x50] sm:$0xff] }
  0x19   : > { %848 = vmatpush.bf16.msra.mxu2 %v746_v1  ;;  %849 = vmatpush.bf16.msra.mxu3 %v746_v1  ;;  %v741_v6 = vld [vmem:[%s1042_s7 + $0x60] sm:$0xff]  ;;  %v742_v10 = vld [vmem:[%s1042_s7 + $0x68] sm:$0xff]  ;;  %v743_v14 = vld [vmem:[%s1042_s7 + $0x70] sm:$0xff]  ;;  %p913_p12 = pnand %p912_p11, %p1019_p5  ;;  %p918_p2 = por %p917_p1, %p916_p0 }
  0x1a   : > { %v732_v15 = vld [vmem:[%s1042_s7 + $0x18] sm:$0xff] }
  0x1b   : > { %v736_v16 = vld [vmem:[%s1042_s7 + $0x38] sm:$0xff]  ;;  %p914_p13 = pneg %p913_p12 }
  0x1c   : > { %369 = vmatpush.bf16.msra.mxu0 %v745_v2  ;;  %850 = vmatpush.bf16.msra.mxu1 %v745_v2  ;;  %v740_v17 = vld [vmem:[%s1042_s7 + $0x58] sm:$0xff] }
  0x1d   : > { %851 = vmatpush.bf16.msra.mxu2 %v745_v2  ;;  %852 = vmatpush.bf16.msra.mxu3 %v745_v2  ;;  %v744_v18 = vld [vmem:[%s1042_s7 + $0x78] sm:$0xff]  ;;  %p919_p3 = pnand %p918_p2, %p914_p13 }
  0x1f   : > { %708 = vmatmul.msk.bf16.vlgmr.msra.gmra.mxu0 %vm313_vm0, %v729_v3  ;;  %712 = vmatmul.msk.bf16.vlgmr.msra.gmra.mxu1 %vm313_vm0, %v733_v4 }
  0x20   : > { %716 = vmatmul.msk.bf16.vlgmr.msra.gmra.mxu2 %vm313_vm0, %v737_v5  ;;  %720 = vmatmul.msk.bf16.vlgmr.msra.gmra.mxu3 %vm313_vm0, %v741_v6 }
  0x2f   : > { %709 = vmatmul.msk.bf16.gmra.mxu0 %vm313_vm0, %v730_v7  ;;  %713 = vmatmul.msk.bf16.gmra.mxu1 %vm313_vm0, %v734_v8 }
  0x30   : > { %717 = vmatmul.msk.bf16.gmra.mxu2 %vm313_vm0, %v738_v9  ;;  %721 = vmatmul.msk.bf16.gmra.mxu3 %vm313_vm0, %v742_v10 }
  0x3f   : > { %710 = vmatmul.msk.bf16.gmra.mxu0 %vm313_vm0, %v731_v11  ;;  %714 = vmatmul.msk.bf16.gmra.mxu1 %vm313_vm0, %v735_v12 }
  0x40   : > { %718 = vmatmul.msk.bf16.gmra.mxu2 %vm313_vm0, %v739_v13  ;;  %722 = vmatmul.msk.bf16.gmra.mxu3 %vm313_vm0, %v743_v14 }
  0x4f   : > { %711 = vmatmul.msk.bf16.gmra.mxu0 %vm313_vm0, %v732_v15  ;;  %715 = vmatmul.msk.bf16.gmra.mxu1 %vm313_vm0, %v736_v16 }
  0x50   : > { %719 = vmatmul.msk.bf16.gmra.mxu2 %vm313_vm0, %v740_v17  ;;  %723 = vmatmul.msk.bf16.gmra.mxu3 %vm313_vm0, %v744_v18 }
  0x9c   : > { %v371_v19 = vpop.f32.mrf.mxu0  ;;  %v391_v20 = vpop.f32.mrf.mxu1 }
  0x9d   : > { %v372_v22 = vadd.f32 %v1079_v21, %v371_v19  ;;  %v392_v23 = vadd.f32 %v1079_v21, %v391_v20 }
  0x9f   : > { %v451_v30 = vmax.f32 %v372_v22, 0.0  ;;  %v459_v31 = vmax.f32 %v392_v23, 0.0 }
  0xa3   : > { %v411_v24 = vpop.f32.mrf.mxu2  ;;  %v431_v25 = vpop.f32.mrf.mxu3 }
  0xa4   : > { %v373_v26 = vpop.f32.mrf.mxu0  ;;  %v393_v27 = vpop.f32.mrf.mxu1  ;;  %v412_v36 = vadd.f32 %v1079_v21, %v411_v24  ;;  %v432_v37 = vadd.f32 %v1079_v21, %v431_v25 }
  0xa5   : > { %v374_v28 = vadd.f32 %v1079_v21, %v373_v26  ;;  %v394_v29 = vadd.f32 %v1079_v21, %v393_v27 }
  0xa6   : > { %v467_v44 = vmax.f32 %v412_v36, 0.0  ;;  %v475_v45 = vmax.f32 %v432_v37, 0.0 }
  0xa7   : > { %v452_v32 = vmax.f32 %v374_v28, 0.0  ;;  %v460_v33 = vmax.f32 %v394_v29, 0.0 }
  0xa9   : > { %v752_v34 = vpack.c.bf16 %v452_v32, %v451_v30  ;;  %v772_v35 = vpack.c.bf16 %v460_v33, %v459_v31 }
  0xab   : > { %753 = vst [vmem:[%s1090_s17] sm:$0xff] %v752_v34   ;;  %v413_v38 = vpop.f32.mrf.mxu2  ;;  %v433_v39 = vpop.f32.mrf.mxu3 }
  0xac   : > { %832 = vst [vmem:[%s1090_s17 + $0x20] sm:$0xff] %v772_v35   ;;  %v414_v40 = vadd.f32 %v1079_v21, %v413_v38  ;;  %v434_v41 = vadd.f32 %v1079_v21, %v433_v39  ;;  %v376_v42 = vpop.f32.mrf.mxu0  ;;  %v396_v43 = vpop.f32.mrf.mxu1 }
  0xad   : > { %v377_v50 = vadd.f32 %v1079_v21, %v376_v42  ;;  %v397_v51 = vadd.f32 %v1079_v21, %v396_v43 }
  0xae   : > { %v468_v46 = vmax.f32 %v414_v40, 0.0  ;;  %v476_v47 = vmax.f32 %v434_v41, 0.0 }
  0xaf   : > { %v453_v58 = vmax.f32 %v377_v50, 0.0  ;;  %v461_v59 = vmax.f32 %v397_v51, 0.0 }
  0xb0   : > { %v792_v48 = vpack.c.bf16 %v468_v46, %v467_v44  ;;  %v812_v49 = vpack.c.bf16 %v476_v47, %v475_v45 }
  0xb2   : > { %836 = vst [vmem:[%s1090_s17 + $0x40] sm:$0xff] %v792_v48  }
  0xb3   : > { %840 = vst [vmem:[%s1090_s17 + $0x60] sm:$0xff] %v812_v49   ;;  %v416_v52 = vpop.f32.mrf.mxu2  ;;  %v436_v53 = vpop.f32.mrf.mxu3 }
  0xb4   : > { %v378_v54 = vpop.f32.mrf.mxu0  ;;  %v398_v55 = vpop.f32.mrf.mxu1  ;;  %v417_v0 = vadd.f32 %v1079_v21, %v416_v52  ;;  %v437_v1 = vadd.f32 %v1079_v21, %v436_v53 }
  0xb5   : > { %v379_v56 = vadd.f32 %v1079_v21, %v378_v54  ;;  %v399_v57 = vadd.f32 %v1079_v21, %v398_v55 }
  0xb6   : > { %v469_v8 = vmax.f32 %v417_v0, 0.0  ;;  %v477_v9 = vmax.f32 %v437_v1, 0.0 }
  0xb7   : > { %v454_v60 = vmax.f32 %v379_v56, 0.0  ;;  %v462_v61 = vmax.f32 %v399_v57, 0.0 }
  0xb9   : > { %v757_v62 = vpack.c.bf16 %v454_v60, %v453_v58  ;;  %v777_v63 = vpack.c.bf16 %v462_v61, %v461_v59 }
  0xbb   : > { %829 = vst [vmem:[%s1090_s17 + $0x8] sm:$0xff] %v757_v62   ;;  %v418_v2 = vpop.f32.mrf.mxu2  ;;  %v438_v3 = vpop.f32.mrf.mxu3 }
  0xbc   : > { %833 = vst [vmem:[%s1090_s17 + $0x28] sm:$0xff] %v777_v63   ;;  %v419_v4 = vadd.f32 %v1079_v21, %v418_v2  ;;  %v439_v5 = vadd.f32 %v1079_v21, %v438_v3  ;;  %v381_v6 = vpop.f32.mrf.mxu0  ;;  %v401_v7 = vpop.f32.mrf.mxu1 }
  0xbd   : > { %v382_v14 = vadd.f32 %v1079_v21, %v381_v6  ;;  %v402_v15 = vadd.f32 %v1079_v21, %v401_v7 }
  0xbe   : > { %v470_v10 = vmax.f32 %v419_v4, 0.0  ;;  %v478_v11 = vmax.f32 %v439_v5, 0.0 }
  0xbf   : > { %v455_v23 = vmax.f32 %v382_v14, 0.0  ;;  %v463_v24 = vmax.f32 %v402_v15, 0.0 }
  0xc0   : > { %v797_v12 = vpack.c.bf16 %v470_v10, %v469_v8  ;;  %v817_v13 = vpack.c.bf16 %v478_v11, %v477_v9 }
  0xc2   : > { %837 = vst [vmem:[%s1090_s17 + $0x48] sm:$0xff] %v797_v12  }
  0xc3   : > { %841 = vst [vmem:[%s1090_s17 + $0x68] sm:$0xff] %v817_v13   ;;  %v421_v16 = vpop.f32.mrf.mxu2  ;;  %v441_v17 = vpop.f32.mrf.mxu3 }
  0xc4   : > { %v383_v18 = vpop.f32.mrf.mxu0  ;;  %v403_v19 = vpop.f32.mrf.mxu1  ;;  %v422_v29 = vadd.f32 %v1079_v21, %v421_v16  ;;  %v442_v30 = vadd.f32 %v1079_v21, %v441_v17 }
  0xc5   : > { %v384_v20 = vadd.f32 %v1079_v21, %v383_v18  ;;  %v404_v22 = vadd.f32 %v1079_v21, %v403_v19 }
  0xc6   : > { %v471_v37 = vmax.f32 %v422_v29, 0.0  ;;  %v479_v38 = vmax.f32 %v442_v30, 0.0 }
  0xc7   : > { %v456_v25 = vmax.f32 %v384_v20, 0.0  ;;  %v464_v26 = vmax.f32 %v404_v22, 0.0 }
  0xc9   : > { %v762_v27 = vpack.c.bf16 %v456_v25, %v455_v23  ;;  %v782_v28 = vpack.c.bf16 %v464_v26, %v463_v24 }
  0xcb   : > { %830 = vst [vmem:[%s1090_s17 + $0x10] sm:$0xff] %v762_v27   ;;  %v423_v31 = vpop.f32.mrf.mxu2  ;;  %v443_v32 = vpop.f32.mrf.mxu3 }
  0xcc   : > { %834 = vst [vmem:[%s1090_s17 + $0x30] sm:$0xff] %v782_v28   ;;  %v424_v33 = vadd.f32 %v1079_v21, %v423_v31  ;;  %v444_v34 = vadd.f32 %v1079_v21, %v443_v32  ;;  %v386_v35 = vpop.f32.mrf.mxu0  ;;  %v406_v36 = vpop.f32.mrf.mxu1 }
  0xcd   : > { %v387_v43 = vadd.f32 %v1079_v21, %v386_v35  ;;  %v407_v44 = vadd.f32 %v1079_v21, %v406_v36 }
  0xce   : > { %v472_v39 = vmax.f32 %v424_v33, 0.0  ;;  %v480_v40 = vmax.f32 %v444_v34, 0.0 }
  0xcf   : > { %v457_v51 = vmax.f32 %v387_v43, 0.0  ;;  %v465_v52 = vmax.f32 %v407_v44, 0.0 }
  0xd0   : > { %v802_v41 = vpack.c.bf16 %v472_v39, %v471_v37  ;;  %v822_v42 = vpack.c.bf16 %v480_v40, %v479_v38 }
  0xd2   : > { %838 = vst [vmem:[%s1090_s17 + $0x50] sm:$0xff] %v802_v41  }
  0xd3   : > { %842 = vst [vmem:[%s1090_s17 + $0x70] sm:$0xff] %v822_v42   ;;  %v426_v45 = vpop.f32.mrf.mxu2  ;;  %v446_v46 = vpop.f32.mrf.mxu3 }
  0xd4   : > { %v388_v47 = vpop.f32.mrf.mxu0  ;;  %v408_v48 = vpop.f32.mrf.mxu1  ;;  %v427_v57 = vadd.f32 %v1079_v21, %v426_v45  ;;  %v447_v58 = vadd.f32 %v1079_v21, %v446_v46 }
  0xd5   : > { %v389_v49 = vadd.f32 %v1079_v21, %v388_v47  ;;  %v409_v50 = vadd.f32 %v1079_v21, %v408_v48 }
  0xd6   : > { %v473_v63 = vmax.f32 %v427_v57, 0.0  ;;  %v481_v0 = vmax.f32 %v447_v58, 0.0 }
  0xd7   : > { %v458_v53 = vmax.f32 %v389_v49, 0.0  ;;  %v466_v54 = vmax.f32 %v409_v50, 0.0 }
  0xd9   : > { %v767_v55 = vpack.c.bf16 %v458_v53, %v457_v51  ;;  %v787_v56 = vpack.c.bf16 %v466_v54, %v465_v52 }
  0xdb   : > { %831 = vst [vmem:[%s1090_s17 + $0x18] sm:$0xff] %v767_v55   ;;  %v428_v59 = vpop.f32.mrf.mxu2  ;;  %v448_v60 = vpop.f32.mrf.mxu3 }
  0xdc   : > { %835 = vst [vmem:[%s1090_s17 + $0x38] sm:$0xff] %v787_v56   ;;  %v429_v61 = vadd.f32 %v1079_v21, %v428_v59  ;;  %v449_v62 = vadd.f32 %v1079_v21, %v448_v60 }
  0xde   : > { %v474_v1 = vmax.f32 %v429_v61, 0.0  ;;  %v482_v2 = vmax.f32 %v449_v62, 0.0 }
  0xe0   : > { %v807_v3 = vpack.c.bf16 %v474_v1, %v473_v63  ;;  %v827_v4 = vpack.c.bf16 %v482_v2, %v481_v0 }
  0xe2   : > { %839 = vst [vmem:[%s1090_s17 + $0x58] sm:$0xff] %v807_v3  }
  0xe3   : > { %843 = vst [vmem:[%s1090_s17 + $0x78] sm:$0xff] %v827_v4  }
  0xe4   : > { %922 = shalt.err (!%p919_p3)
}
  0xe5   : > { %s959_s8 = smov 64   ;;  %s960_s9 = smov 4  }
  0xe6   : > { %853 = dma.vmem_to_hbm [thread:$0]  (%p1019_p5), %s561_s16, 2048, %s563_s26, %s548_s27, %s959_s8, %s959_s8, %s960_s9  }
  0xe7 PF: > { %p859_p4 = scmp.ge.s32.totalorder %s957_s15, 2  ;;  %s577_s10 = sand.u32 1, %s945_s12  }
  0xe8   : > { %s578_s11 = scalar_lea.sflag [#allocation3], %s577_s10 }
  0xe9   : > { %p856_p7 = pnand %p859_p4, %p1023_p6 }
  0xeb   : > { %p857_p8 = pneg %p856_p7 }
  0xed   : > { %940 = dma.done.wait (%p857_p8), %s578_s11, 2048  }
  0xee   : > { %942 = vsyncadd (%p857_p8), %s578_s11, 4294965248  ;;  %p13_p9 = scmp.ge.s32.totalorder %s1006_s18, 4   ;;  %s1174_s12 = smov %s949_s13 }
  0xef   : > { %s1175_s13 = smov %s953_s14  ;;  %s1176_s14 = smov %s1017_s21 }
  0xf0   : > { %s1177_s15 = smov %s1006_s18  ;;  %15 = sbr.rel (!%p13_p9) target bundleno = 3 (0x3), region = 67 }
  0xf5   :  { %584 = vsyncpa [#allocation3], 1 }
  0xf6   :  { %586 = vsyncpa [#allocation3 + $0x1], 1 }

</bundles_post_ra>
